<compile_context>
chip_gen: v7x
topology: tpu7x:2x2x1
jax: 0.10.0
libtpu: 0.0.40
codegen_flags: <defaults>
</compile_context>

<pallas_src>
import functools

import jax
import jax.numpy as jnp
from jax.experimental import pallas as pl
from jax.experimental.pallas import tpu as pltpu

_LANE = 128


def _round_up(n: int, m: int) -> int:
    return ((n + m - 1) // m) * m


def qnet_kernel(x_ref, w0_ref, b0_ref, w1_ref, b1_ref, w2_ref, b2_ref, q_ref):
    # fc0 + relu  (bf16 x bf16 -> f32 accumulation on the MXU)
    h0 = jnp.dot(x_ref[...], w0_ref[...], preferred_element_type=jnp.float32)
    h0 = jnp.maximum(h0 + b0_ref[...], 0.0)
    # fc1 + relu
    h1 = jnp.dot(h0.astype(w1_ref.dtype), w1_ref[...],
                 preferred_element_type=jnp.float32)
    h1 = jnp.maximum(h1 + b1_ref[...], 0.0)
    # fc2 (no activation); output tile is lane-dense (padded to 128 lanes).
    q = jnp.dot(h1.astype(w2_ref.dtype), w2_ref[...],
                preferred_element_type=jnp.float32) + b2_ref[...]
    q_ref[...] = q.astype(q_ref.dtype)


@functools.partial(
    jax.jit, static_argnames=("tile_b", "compute_dtype", "single_buffer_weights"))
def qnet_forward(x, w0, b0, w1, b1, w2, b2, *, tile_b=256,
                 compute_dtype=jnp.bfloat16, single_buffer_weights=True):
    B, state_dim = x.shape
    hidden = w0.shape[1]
    action_cnt = w2.shape[1]
    out_dtype = x.dtype
    cd = compute_dtype

    sd_p = _round_up(state_dim, _LANE)     # lane-pad features
    ac_p = _round_up(action_cnt, _LANE)    # lane-pad actions (lane-dense output)
    assert hidden % _LANE == 0

    # Zero-padded, bf16 operands (zeros in the pad leave the results unchanged).
    x_p = jnp.zeros((B, sd_p), cd).at[:, :state_dim].set(x.astype(cd))
    w0_p = jnp.zeros((sd_p, hidden), cd).at[:state_dim, :].set(w0.astype(cd))
    w1_c = w1.astype(cd)
    w2_p = jnp.zeros((hidden, ac_p), cd).at[:, :action_cnt].set(w2.astype(cd))
    b0_f = b0.astype(jnp.float32).reshape(1, hidden)
    b1_f = b1.astype(jnp.float32).reshape(1, hidden)
    b2_p = jnp.zeros((1, ac_p), jnp.float32).at[:, :action_cnt].set(
        b2.astype(jnp.float32).reshape(1, action_cnt))

    # MXU-aligned batch tile; for tiny batches use the whole batch (grid = (1,)).
    tb = tile_b if B > tile_b else B
    grid = (pl.cdiv(B, tb),)

    def resident(shape):
        # Constant index_map -> weights/biases stay resident in VMEM across the
        # batch grid; single-buffer them (the second buffer would never be used).
        kwargs = {}
        if single_buffer_weights:
            kwargs["pipeline_mode"] = pl.Buffered(1)
        return pl.BlockSpec(shape, lambda i: (0, 0), **kwargs)

    itemsize_cd = jnp.dtype(cd).itemsize
    flops = 2 * B * (sd_p * hidden + hidden * hidden + hidden * ac_p)
    bytes_accessed = int(
        B * sd_p * itemsize_cd
        + (sd_p * hidden + hidden * hidden + hidden * ac_p) * itemsize_cd
        + (2 * hidden + ac_p) * 4
        + B * ac_p * jnp.dtype(out_dtype).itemsize)
    cost = pl.CostEstimate(flops=int(flops), transcendentals=0,
                           bytes_accessed=bytes_accessed)

    q_p = pl.pallas_call(
        qnet_kernel,
        out_shape=jax.ShapeDtypeStruct((B, ac_p), out_dtype),
        grid_spec=pltpu.PrefetchScalarGridSpec(
            num_scalar_prefetch=0,
            grid=grid,
            in_specs=[
                pl.BlockSpec((tb, sd_p), lambda i: (i, 0)),   # x batch tile
                resident((sd_p, hidden)),                     # w0
                resident((1, hidden)),                        # b0
                resident((hidden, hidden)),                   # w1
                resident((1, hidden)),                        # b1
                resident((hidden, ac_p)),                     # w2
                resident((1, ac_p)),                          # b2
            ],
            out_specs=pl.BlockSpec((tb, ac_p), lambda i: (i, 0)),
        ),
        compiler_params=pltpu.CompilerParams(
            dimension_semantics=("parallel",),   # shard batch grid across v7x TCs
        ),
        cost_estimate=cost,
    )(x_p, w0_p, b0_f, w1_c, b1_f, w2_p, b2_p)

    return q_p[:, :action_cnt]


def init_qnet_params(key, state_dim, action_cnt, hidden=256, dtype=jnp.float32):
    """PyTorch-style Linear init: U(-1/sqrt(fan_in), 1/sqrt(fan_in)).

    Weights are returned already transposed to (in, out) for the kernel.
    """
    keys = jax.random.split(key, 6)

    def linear(kw, kb, fan_in, fan_out):
        bound = 1.0 / jnp.sqrt(fan_in)
        w = jax.random.uniform(kw, (fan_in, fan_out), dtype, -bound, bound)
        b = jax.random.uniform(kb, (1, fan_out), dtype, -bound, bound)
        return w, b

    w0, b0 = linear(keys[0], keys[1], state_dim, hidden)
    w1, b1 = linear(keys[2], keys[3], hidden, hidden)
    w2, b2 = linear(keys[4], keys[5], hidden, action_cnt)
    return w0, b0, w1, b1, w2, b2


def qnet_reference(x, w0, b0, w1, b1, w2, b2, compute_dtype=jnp.bfloat16):
    """Pure-JAX reference mirroring the kernel dtypes (bf16 inputs, f32 accum)."""
    cd = compute_dtype
    h0 = jnp.dot(x.astype(cd), w0.astype(cd), preferred_element_type=jnp.float32)
    h0 = jnp.maximum(h0 + b0.astype(jnp.float32), 0.0)
    h1 = jnp.dot(h0.astype(cd), w1.astype(cd), preferred_element_type=jnp.float32)
    h1 = jnp.maximum(h1 + b1.astype(jnp.float32), 0.0)
    return (jnp.dot(h1.astype(cd), w2.astype(cd), preferred_element_type=jnp.float32)
            + b2.astype(jnp.float32))


if __name__ == "__main__":
    key = jax.random.PRNGKey(0)
    k_x, k_p, k_x2 = jax.random.split(key, 3)

    state_dim = 16
    action_cnt = 8
    params = init_qnet_params(k_p, state_dim, action_cnt)

    def run(x):
        try:
            return jax.block_until_ready(qnet_forward(x, *params))
        except Exception:
            # Fallback if this JAX build rejects single-buffered (Buffered(1))
            # weight specs; everything else is unchanged.
            return jax.block_until_ready(
                qnet_forward(x, *params, single_buffer_weights=False))

    # Small batch -> single grid step (no per-step pipeline overhead).
    x_small = jax.random.normal(k_x, (8, state_dim), jnp.float32)
    q_small = run(x_small)
    ref_small = qnet_reference(x_small, *params)
    assert q_small.shape == (8, action_cnt)
    assert jnp.allclose(q_small, ref_small, atol=1e-2, rtol=1e-2), "mismatch (small)"

    # Larger batch exercising the tiled multi-step grid path (tile_b=256 -> 2 steps).
    x_big = jax.random.normal(k_x2, (512, state_dim), jnp.float32)
    q_big = run(x_big)
    ref_big = qnet_reference(x_big, *params)
    assert q_big.shape == (512, action_cnt)
    assert jnp.allclose(q_big, ref_big, atol=1e-2, rtol=1e-2), "mismatch (big)"

    print("KERNEL_OK")
</pallas_src>

<mosaic_0001>
module attributes {stable_mosaic.version = 11 : i64} {
  func.func @qnet_kernel(%arg0: i32, %arg1: memref<8x128xbf16, #tpu.memory_space<vmem>>, %arg2: memref<128x256xbf16, #tpu.memory_space<vmem>>, %arg3: memref<1x256xf32, #tpu.memory_space<vmem>>, %arg4: memref<256x256xbf16, #tpu.memory_space<vmem>>, %arg5: memref<1x256xf32, #tpu.memory_space<vmem>>, %arg6: memref<256x128xbf16, #tpu.memory_space<vmem>>, %arg7: memref<1x128xf32, #tpu.memory_space<vmem>>, %arg8: memref<8x128xf32, #tpu.memory_space<vmem>>) attributes {dimension_semantics = [#tpu.dimension_semantics<parallel>], iteration_bounds = array<i64: 1>, scalar_prefetch = 0 : i64, scratch_operands = 0 : i64, tpu.core_type = #tpu.core_type<tc>, window_params = [{transform_indices = @transform_0, window_bounds = array<i64: 8, 128>}, {pipeline_mode = #tpu.pipeline_mode<synchronous>, transform_indices = @transform_1, window_bounds = array<i64: 128, 256>}, {pipeline_mode = #tpu.pipeline_mode<synchronous>, transform_indices = @transform_2, window_bounds = array<i64: 1, 256>}, {pipeline_mode = #tpu.pipeline_mode<synchronous>, transform_indices = @transform_3, window_bounds = array<i64: 256, 256>}, {pipeline_mode = #tpu.pipeline_mode<synchronous>, transform_indices = @transform_4, window_bounds = array<i64: 1, 256>}, {pipeline_mode = #tpu.pipeline_mode<synchronous>, transform_indices = @transform_5, window_bounds = array<i64: 256, 128>}, {pipeline_mode = #tpu.pipeline_mode<synchronous>, transform_indices = @transform_6, window_bounds = array<i64: 1, 128>}, {transform_indices = @transform_7, window_bounds = array<i64: 8, 128>}]} {
    %c0 = arith.constant 0 : index
    %c0_0 = arith.constant 0 : index
    %0 = vector.load %arg1[%c0, %c0_0] : memref<8x128xbf16, #tpu.memory_space<vmem>>, vector<8x128xbf16>
    %c0_1 = arith.constant 0 : index
    %c0_2 = arith.constant 0 : index
    %1 = vector.load %arg2[%c0_1, %c0_2] : memref<128x256xbf16, #tpu.memory_space<vmem>>, vector<128x256xbf16>
    %cst = arith.constant dense<0.000000e+00> : vector<8x256xf32>
    %2 = tpu.matmul %0, %1, %cst {dimension_numbers = #tpu.dot_dimension_numbers<[1], [0], [0], [1], [0, 0, 1, 1], [], []>} : vector<8x128xbf16>, vector<128x256xbf16>, vector<8x256xf32> -> vector<8x256xf32>
    %c0_3 = arith.constant 0 : index
    %c0_4 = arith.constant 0 : index
    %3 = vector.load %arg3[%c0_3, %c0_4] : memref<1x256xf32, #tpu.memory_space<vmem>>, vector<1x256xf32>
    %4 = vector.broadcast %3 : vector<1x256xf32> to vector<8x256xf32>
    %5 = arith.addf %2, %4 : vector<8x256xf32>
    %cst_5 = arith.constant 0.000000e+00 : f32
    %6 = vector.broadcast %cst_5 : f32 to vector<8x256xf32>
    %7 = arith.maximumf %5, %6 : vector<8x256xf32>
    %8 = arith.truncf %7 : vector<8x256xf32> to vector<8x256xbf16>
    %c0_6 = arith.constant 0 : index
    %c0_7 = arith.constant 0 : index
    %9 = vector.load %arg4[%c0_6, %c0_7] : memref<256x256xbf16, #tpu.memory_space<vmem>>, vector<256x256xbf16>
    %cst_8 = arith.constant dense<0.000000e+00> : vector<8x256xf32>
    %10 = tpu.matmul %8, %9, %cst_8 {dimension_numbers = #tpu.dot_dimension_numbers<[1], [0], [0], [1], [0, 0, 1, 1], [], []>} : vector<8x256xbf16>, vector<256x256xbf16>, vector<8x256xf32> -> vector<8x256xf32>
    %c0_9 = arith.constant 0 : index
    %c0_10 = arith.constant 0 : index
    %11 = vector.load %arg5[%c0_9, %c0_10] : memref<1x256xf32, #tpu.memory_space<vmem>>, vector<1x256xf32>
    %12 = vector.broadcast %11 : vector<1x256xf32> to vector<8x256xf32>
    %13 = arith.addf %10, %12 : vector<8x256xf32>
    %cst_11 = arith.constant 0.000000e+00 : f32
    %14 = vector.broadcast %cst_11 : f32 to vector<8x256xf32>
    %15 = arith.maximumf %13, %14 : vector<8x256xf32>
    %16 = arith.truncf %15 : vector<8x256xf32> to vector<8x256xbf16>
    %c0_12 = arith.constant 0 : index
    %c0_13 = arith.constant 0 : index
    %17 = vector.load %arg6[%c0_12, %c0_13] : memref<256x128xbf16, #tpu.memory_space<vmem>>, vector<256x128xbf16>
    %cst_14 = arith.constant dense<0.000000e+00> : vector<8x128xf32>
    %18 = tpu.matmul %16, %17, %cst_14 {dimension_numbers = #tpu.dot_dimension_numbers<[1], [0], [0], [1], [0, 0, 1, 1], [], []>} : vector<8x256xbf16>, vector<256x128xbf16>, vector<8x128xf32> -> vector<8x128xf32>
    %c0_15 = arith.constant 0 : index
    %c0_16 = arith.constant 0 : index
    %19 = vector.load %arg7[%c0_15, %c0_16] : memref<1x128xf32, #tpu.memory_space<vmem>>, vector<1x128xf32>
    %20 = vector.broadcast %19 : vector<1x128xf32> to vector<8x128xf32>
    %21 = arith.addf %18, %20 : vector<8x128xf32>
    %c0_17 = arith.constant 0 : index
    %c0_18 = arith.constant 0 : index
    %22 = vector.load %arg8[%c0_17, %c0_18] : memref<8x128xf32, #tpu.memory_space<vmem>>, vector<8x128xf32>
    tpu.vector_store %arg8[%c0_17, %c0_18], %21 {strides = array<i32>} : memref<8x128xf32, #tpu.memory_space<vmem>>, vector<8x128xf32>,
    return
  }
  func.func @transform_0(%arg0: i32) -> (i32, i32) {
    %c0_i32 = arith.constant 0 : i32
    %c0_i32_0 = arith.constant 0 : i32
    return %arg0, %c0_i32 : i32, i32
  }
  func.func @transform_1(%arg0: i32) -> (i32, i32) {
    %c0_i32 = arith.constant 0 : i32
    %c0_i32_0 = arith.constant 0 : i32
    %c0_i32_1 = arith.constant 0 : i32
    return %c0_i32, %c0_i32_0 : i32, i32
  }
  func.func @transform_2(%arg0: i32) -> (i32, i32) {
    %c0_i32 = arith.constant 0 : i32
    %c0_i32_0 = arith.constant 0 : i32
    %c0_i32_1 = arith.constant 0 : i32
    return %c0_i32, %c0_i32_0 : i32, i32
  }
  func.func @transform_3(%arg0: i32) -> (i32, i32) {
    %c0_i32 = arith.constant 0 : i32
    %c0_i32_0 = arith.constant 0 : i32
    %c0_i32_1 = arith.constant 0 : i32
    return %c0_i32, %c0_i32_0 : i32, i32
  }
  func.func @transform_4(%arg0: i32) -> (i32, i32) {
    %c0_i32 = arith.constant 0 : i32
    %c0_i32_0 = arith.constant 0 : i32
    %c0_i32_1 = arith.constant 0 : i32
    return %c0_i32, %c0_i32_0 : i32, i32
  }
  func.func @transform_5(%arg0: i32) -> (i32, i32) {
    %c0_i32 = arith.constant 0 : i32
    %c0_i32_0 = arith.constant 0 : i32
    %c0_i32_1 = arith.constant 0 : i32
    return %c0_i32, %c0_i32_0 : i32, i32
  }
  func.func @transform_6(%arg0: i32) -> (i32, i32) {
    %c0_i32 = arith.constant 0 : i32
    %c0_i32_0 = arith.constant 0 : i32
    %c0_i32_1 = arith.constant 0 : i32
    return %c0_i32, %c0_i32_0 : i32, i32
  }
  func.func @transform_7(%arg0: i32) -> (i32, i32) {
    %c0_i32 = arith.constant 0 : i32
    %c0_i32_0 = arith.constant 0 : i32
    return %arg0, %c0_i32 : i32, i32
  }
}

module attributes {stable_mosaic.version = 11 : i64} {
  func.func @qnet_kernel(%arg0: i32, %arg1: memref<8x128xbf16, #tpu.memory_space<vmem>>, %arg2: memref<128x256xbf16, #tpu.memory_space<vmem>>, %arg3: memref<1x256xf32, #tpu.memory_space<vmem>>, %arg4: memref<256x256xbf16, #tpu.memory_space<vmem>>, %arg5: memref<1x256xf32, #tpu.memory_space<vmem>>, %arg6: memref<256x128xbf16, #tpu.memory_space<vmem>>, %arg7: memref<1x128xf32, #tpu.memory_space<vmem>>, %arg8: memref<8x128xf32, #tpu.memory_space<vmem>>) attributes {dimension_semantics = [#tpu.dimension_semantics<parallel>], iteration_bounds = array<i64: 1>, scalar_prefetch = 0 : i64, scratch_operands = 0 : i64, tpu.core_type = #tpu.core_type<tc>, window_params = [{transform_indices = @transform_0, window_bounds = array<i64: 8, 128>}, {pipeline_mode = #tpu.pipeline_mode<synchronous>, transform_indices = @transform_1, window_bounds = array<i64: 128, 256>}, {pipeline_mode = #tpu.pipeline_mode<synchronous>, transform_indices = @transform_2, window_bounds = array<i64: 1, 256>}, {pipeline_mode = #tpu.pipeline_mode<synchronous>, transform_indices = @transform_3, window_bounds = array<i64: 256, 256>}, {pipeline_mode = #tpu.pipeline_mode<synchronous>, transform_indices = @transform_4, window_bounds = array<i64: 1, 256>}, {pipeline_mode = #tpu.pipeline_mode<synchronous>, transform_indices = @transform_5, window_bounds = array<i64: 256, 128>}, {pipeline_mode = #tpu.pipeline_mode<synchronous>, transform_indices = @transform_6, window_bounds = array<i64: 1, 128>}, {transform_indices = @transform_7, window_bounds = array<i64: 8, 128>}]} {
    %c0 = arith.constant 0 : index
    %c0_0 = arith.constant 0 : index
    %0 = vector.load %arg1[%c0, %c0_0] : memref<8x128xbf16, #tpu.memory_space<vmem>>, vector<8x128xbf16>
    %c0_1 = arith.constant 0 : index
    %c0_2 = arith.constant 0 : index
    %1 = vector.load %arg2[%c0_1, %c0_2] : memref<128x256xbf16, #tpu.memory_space<vmem>>, vector<128x256xbf16>
    %cst = arith.constant dense<0.000000e+00> : vector<8x256xf32>
    %2 = tpu.matmul %0, %1, %cst {dimension_numbers = #tpu.dot_dimension_numbers<[1], [0], [0], [1], [0, 0, 1, 1], [], []>} : vector<8x128xbf16>, vector<128x256xbf16>, vector<8x256xf32> -> vector<8x256xf32>
    %c0_3 = arith.constant 0 : index
    %c0_4 = arith.constant 0 : index
    %3 = vector.load %arg3[%c0_3, %c0_4] : memref<1x256xf32, #tpu.memory_space<vmem>>, vector<1x256xf32>
    %4 = vector.broadcast %3 : vector<1x256xf32> to vector<8x256xf32>
    %5 = arith.addf %2, %4 : vector<8x256xf32>
    %cst_5 = arith.constant 0.000000e+00 : f32
    %6 = vector.broadcast %cst_5 : f32 to vector<8x256xf32>
    %7 = arith.maximumf %5, %6 : vector<8x256xf32>
    %8 = arith.truncf %7 : vector<8x256xf32> to vector<8x256xbf16>
    %c0_6 = arith.constant 0 : index
    %c0_7 = arith.constant 0 : index
    %9 = vector.load %arg4[%c0_6, %c0_7] : memref<256x256xbf16, #tpu.memory_space<vmem>>, vector<256x256xbf16>
    %cst_8 = arith.constant dense<0.000000e+00> : vector<8x256xf32>
    %10 = tpu.matmul %8, %9, %cst_8 {dimension_numbers = #tpu.dot_dimension_numbers<[1], [0], [0], [1], [0, 0, 1, 1], [], []>} : vector<8x256xbf16>, vector<256x256xbf16>, vector<8x256xf32> -> vector<8x256xf32>
    %c0_9 = arith.constant 0 : index
    %c0_10 = arith.constant 0 : index
    %11 = vector.load %arg5[%c0_9, %c0_10] : memref<1x256xf32, #tpu.memory_space<vmem>>, vector<1x256xf32>
    %12 = vector.broadcast %11 : vector<1x256xf32> to vector<8x256xf32>
    %13 = arith.addf %10, %12 : vector<8x256xf32>
    %cst_11 = arith.constant 0.000000e+00 : f32
    %14 = vector.broadcast %cst_11 : f32 to vector<8x256xf32>
    %15 = arith.maximumf %13, %14 : vector<8x256xf32>
    %16 = arith.truncf %15 : vector<8x256xf32> to vector<8x256xbf16>
    %c0_12 = arith.constant 0 : index
    %c0_13 = arith.constant 0 : index
    %17 = vector.load %arg6[%c0_12, %c0_13] : memref<256x128xbf16, #tpu.memory_space<vmem>>, vector<256x128xbf16>
    %cst_14 = arith.constant dense<0.000000e+00> : vector<8x128xf32>
    %18 = tpu.matmul %16, %17, %cst_14 {dimension_numbers = #tpu.dot_dimension_numbers<[1], [0], [0], [1], [0, 0, 1, 1], [], []>} : vector<8x256xbf16>, vector<256x128xbf16>, vector<8x128xf32> -> vector<8x128xf32>
    %c0_15 = arith.constant 0 : index
    %c0_16 = arith.constant 0 : index
    %19 = vector.load %arg7[%c0_15, %c0_16] : memref<1x128xf32, #tpu.memory_space<vmem>>, vector<1x128xf32>
    %20 = vector.broadcast %19 : vector<1x128xf32> to vector<8x128xf32>
    %21 = arith.addf %18, %20 : vector<8x128xf32>
    %c0_17 = arith.constant 0 : index
    %c0_18 = arith.constant 0 : index
    %22 = vector.load %arg8[%c0_17, %c0_18] : memref<8x128xf32, #tpu.memory_space<vmem>>, vector<8x128xf32>
    tpu.vector_store %arg8[%c0_17, %c0_18], %21 {strides = array<i32>} : memref<8x128xf32, #tpu.memory_space<vmem>>, vector<8x128xf32>,
    return
  }
  func.func @transform_0(%arg0: i32) -> (i32, i32) {
    %c0_i32 = arith.constant 0 : i32
    %c0_i32_0 = arith.constant 0 : i32
    return %arg0, %c0_i32 : i32, i32
  }
  func.func @transform_1(%arg0: i32) -> (i32, i32) {
    %c0_i32 = arith.constant 0 : i32
    %c0_i32_0 = arith.constant 0 : i32
    %c0_i32_1 = arith.constant 0 : i32
    return %c0_i32, %c0_i32_0 : i32, i32
  }
  func.func @transform_2(%arg0: i32) -> (i32, i32) {
    %c0_i32 = arith.constant 0 : i32
    %c0_i32_0 = arith.constant 0 : i32
    %c0_i32_1 = arith.constant 0 : i32
    return %c0_i32, %c0_i32_0 : i32, i32
  }
  func.func @transform_3(%arg0: i32) -> (i32, i32) {
    %c0_i32 = arith.constant 0 : i32
    %c0_i32_0 = arith.constant 0 : i32
    %c0_i32_1 = arith.constant 0 : i32
    return %c0_i32, %c0_i32_0 : i32, i32
  }
  func.func @transform_4(%arg0: i32) -> (i32, i32) {
    %c0_i32 = arith.constant 0 : i32
    %c0_i32_0 = arith.constant 0 : i32
    %c0_i32_1 = arith.constant 0 : i32
    return %c0_i32, %c0_i32_0 : i32, i32
  }
  func.func @transform_5(%arg0: i32) -> (i32, i32) {
    %c0_i32 = arith.constant 0 : i32
    %c0_i32_0 = arith.constant 0 : i32
    %c0_i32_1 = arith.constant 0 : i32
    return %c0_i32, %c0_i32_0 : i32, i32
  }
  func.func @transform_6(%arg0: i32) -> (i32, i32) {
    %c0_i32 = arith.constant 0 : i32
    %c0_i32_0 = arith.constant 0 : i32
    %c0_i32_1 = arith.constant 0 : i32
    return %c0_i32, %c0_i32_0 : i32, i32
  }
  func.func @transform_7(%arg0: i32) -> (i32, i32) {
    %c0_i32 = arith.constant 0 : i32
    %c0_i32_0 = arith.constant 0 : i32
    return %arg0, %c0_i32 : i32, i32
  }
}

</mosaic_0001>

<bundles_post_ra>
// kernel: qnet_forward.1
= control target key start
LH: loop header
LB: loop body
LE: loop exit
PB: predicated region body
PF: predicated region fallthrough
CT: control target
= control target key end

     0   :  { %v822_v2 = vmov 0   ;;  %s1080_s0 = inlined_call_operand.vmem [shape: bf16[8,128], index: 0, kind: input, shape index: {}]   ;;  %s1081_s1 = inlined_call_operand.vmem [shape: bf16[128,256], index: 1, kind: input, shape index: {}]   ;;  %s1082_s2 = inlined_call_operand.vmem [shape: f32[1,256], index: 2, kind: input, shape index: {}]   ;;  %s1083_s3 = inlined_call_operand.vmem [shape: bf16[256,256], index: 3, kind: input, shape index: {}]   ;;  %s1084_s4 = inlined_call_operand.vmem [shape: f32[1,256], index: 4, kind: input, shape index: {}]   ;;  %s1085_s5 = inlined_call_operand.vmem [shape: bf16[256,128], index: 5, kind: input, shape index: {}]   ;;  %s1086_s6 = inlined_call_operand.vmem [shape: f32[1,128], index: 6, kind: input, shape index: {}]   ;;  %s1087_s7 = inlined_call_operand.hbm [shape: f32[8,128], index: 7, kind: output, shape index: {}]  }
   0x1   :  { %v710_v0 = vld [vmem:[%s1081_s1 + $0x4] ss:$8 sps:$4 sm:$0xff]   ;;  %v712_v1 = vld [vmem:[%s1081_s1] ss:$8 sps:$4 sm:$0xff]   ;;  %169 = vmatprep.mubr.bf16.mxu0 %v822_v2  ;;  %v713_v3 = vld [vmem:[%s1081_s1 + $0x14] ss:$8 sps:$4 sm:$0xff]  }
   0x2   :  { %137 = vmatprep.subr.bf16.mxu0 %v710_v0  ;;  %v715_v4 = vld [vmem:[%s1081_s1 + $0x10] ss:$8 sps:$4 sm:$0xff]   ;;  %v716_v5 = vld [vmem:[%s1081_s1 + $0x24] ss:$8 sps:$4 sm:$0xff]   ;;  %v718_v6 = vld [vmem:[%s1081_s1 + $0x20] ss:$8 sps:$4 sm:$0xff]  }
   0x3   :  { %138 = vmatpush1.bf16.msra.mxu0 %v712_v1  ;;  %v719_v7 = vld [vmem:[%s1081_s1 + $0x34] ss:$8 sps:$4 sm:$0xff]   ;;  %v721_v8 = vld [vmem:[%s1081_s1 + $0x30] ss:$8 sps:$4 sm:$0xff]   ;;  %v722_v9 = vld [vmem:[%s1081_s1 + $0x44] ss:$8 sps:$4 sm:$0xff]  }
   0x4   :  { %139 = vmatprep.subr.bf16.mxu0 %v713_v3  ;;  %v734_v10 = vld [vmem:[%s1083_s3 + $0x4] ss:$8 sps:$4 sm:$0xff]   ;;  %v736_v11 = vld [vmem:[%s1083_s3] ss:$8 sps:$4 sm:$0xff]   ;;  %v737_v12 = vld [vmem:[%s1083_s3 + $0x14] ss:$8 sps:$4 sm:$0xff]  }
   0x5   :  { %386 = vmatprep.subr.bf16.mxu1 %v734_v10  ;;  %v724_v13 = vld [vmem:[%s1081_s1 + $0x40] ss:$8 sps:$4 sm:$0xff]   ;;  %v739_v14 = vld [vmem:[%s1083_s3 + $0x10] ss:$8 sps:$4 sm:$0xff]   ;;  %v740_v15 = vld [vmem:[%s1083_s3 + $0x24] ss:$8 sps:$4 sm:$0xff]  }
   0x6   :  { %387 = vmatpush1.bf16.msra.mxu1 %v736_v11  ;;  %v725_v16 = vld [vmem:[%s1081_s1 + $0x54] ss:$8 sps:$4 sm:$0xff]   ;;  %v727_v17 = vld [vmem:[%s1081_s1 + $0x50] ss:$8 sps:$4 sm:$0xff]   ;;  %v742_v18 = vld [vmem:[%s1083_s3 + $0x20] ss:$8 sps:$4 sm:$0xff]  }
   0x7   :  { %140 = vmatpush1.bf16.msra.mxu0 %v715_v4  ;;  %388 = vmatprep.subr.bf16.mxu1 %v737_v12  ;;  %v743_v19 = vld [vmem:[%s1083_s3 + $0x34] ss:$8 sps:$4 sm:$0xff]   ;;  %v728_v20 = vld [vmem:[%s1081_s1 + $0x64] ss:$8 sps:$4 sm:$0xff]   ;;  %v730_v21 = vld [vmem:[%s1081_s1 + $0x60] ss:$8 sps:$4 sm:$0xff]  }
   0x8   :  { %141 = vmatprep.subr.bf16.mxu0 %v716_v5  ;;  %v745_v22 = vld [vmem:[%s1083_s3 + $0x30] ss:$8 sps:$4 sm:$0xff]   ;;  %v746_v23 = vld [vmem:[%s1083_s3 + $0x44] ss:$8 sps:$4 sm:$0xff]   ;;  %v731_v24 = vld [vmem:[%s1081_s1 + $0x74] ss:$8 sps:$4 sm:$0xff]  }
   0x9   :  { %v733_v25 = vld [vmem:[%s1081_s1 + $0x70] ss:$8 sps:$4 sm:$0xff]   ;;  %v748_v26 = vld [vmem:[%s1083_s3 + $0x40] ss:$8 sps:$4 sm:$0xff]   ;;  %v749_v27 = vld [vmem:[%s1083_s3 + $0x54] ss:$8 sps:$4 sm:$0xff]  }
   0xa   :  { %389 = vmatpush1.bf16.msra.mxu1 %v739_v14  ;;  %v28_v28 = vld [vmem:[%s1080_s0] sm:$0xf]  ;;  %v751_v29 = vld [vmem:[%s1083_s3 + $0x50] ss:$8 sps:$4 sm:$0xff]   ;;  %v752_v30 = vld [vmem:[%s1083_s3 + $0x64] ss:$8 sps:$4 sm:$0xff]  }
   0xb   :  { %142 = vmatpush1.bf16.msra.mxu0 %v718_v6  ;;  %390 = vmatprep.subr.bf16.mxu1 %v740_v15  ;;  %v754_v31 = vld [vmem:[%s1083_s3 + $0x60] ss:$8 sps:$4 sm:$0xff]   ;;  %v755_v32 = vld [vmem:[%s1083_s3 + $0x74] ss:$8 sps:$4 sm:$0xff]   ;;  %v757_v33 = vld [vmem:[%s1083_s3 + $0x70] ss:$8 sps:$4 sm:$0xff]  }
   0xc   :  { %143 = vmatprep.subr.bf16.mxu0 %v719_v7  ;;  %v758_v34 = vld [vmem:[%s1083_s3 + $0x84] ss:$8 sps:$4 sm:$0xff]   ;;  %v760_v35 = vld [vmem:[%s1083_s3 + $0x80] ss:$8 sps:$4 sm:$0xff]  }
   0xe   :  { %391 = vmatpush1.bf16.msra.mxu1 %v742_v18 }
   0xf   :  { %144 = vmatpush1.bf16.msra.mxu0 %v721_v8  ;;  %392 = vmatprep.subr.bf16.mxu1 %v743_v19 }
  0x10   :  { %145 = vmatprep.subr.bf16.mxu0 %v722_v9 }
  0x12   :  { %393 = vmatpush1.bf16.msra.mxu1 %v745_v22 }
  0x13   :  { %146 = vmatpush1.bf16.msra.mxu0 %v724_v13  ;;  %394 = vmatprep.subr.bf16.mxu1 %v746_v23 }
  0x14   :  { %147 = vmatprep.subr.bf16.mxu0 %v725_v16 }
  0x16   :  { %395 = vmatpush1.bf16.msra.mxu1 %v748_v26 }
  0x17   :  { %148 = vmatpush1.bf16.msra.mxu0 %v727_v17  ;;  %396 = vmatprep.subr.bf16.mxu1 %v749_v27 }
  0x18   :  { %149 = vmatprep.subr.bf16.mxu0 %v728_v20 }
  0x1a   :  { %397 = vmatpush1.bf16.msra.mxu1 %v751_v29 }
  0x1b   :  { %150 = vmatpush1.bf16.msra.mxu0 %v730_v21  ;;  %398 = vmatprep.subr.bf16.mxu1 %v752_v30 }
  0x1c   :  { %151 = vmatprep.subr.bf16.mxu0 %v731_v24 }
  0x1e   :  { %399 = vmatpush1.bf16.msra.mxu1 %v754_v31 }
  0x1f   :  { %152 = vmatpush1.bf16.msra.mxu0 %v733_v25  ;;  %400 = vmatprep.subr.bf16.mxu1 %v755_v32 }
  0x22   :  { %170 = vmatmul.mubr.bf16.vlgmr.msra.gmra.mrb[0].mxu0 %v28_v28  ;;  %401 = vmatpush1.bf16.msra.mxu1 %v757_v33 }
  0x23   :  { %12 = vsyncpa [#allocation3], 0  ;;  %402 = vmatprep.subr.bf16.mxu1 %v758_v34  ;;  %v761_v36 = vld [vmem:[%s1083_s3 + $0x94] ss:$8 sps:$4 sm:$0xff]   ;;  %v763_v37 = vld [vmem:[%s1083_s3 + $0x90] ss:$8 sps:$4 sm:$0xff]   ;;  %v47_v62 = vlaneseq }
  0x24   :  { %v764_v38 = vld [vmem:[%s1083_s3 + $0xa4] ss:$8 sps:$4 sm:$0xff]   ;;  %v766_v39 = vld [vmem:[%s1083_s3 + $0xa0] ss:$8 sps:$4 sm:$0xff]   ;;  %v767_v40 = vld [vmem:[%s1083_s3 + $0xb4] ss:$8 sps:$4 sm:$0xff]  }
  0x25   :  { %v769_v41 = vld [vmem:[%s1083_s3 + $0xb0] ss:$8 sps:$4 sm:$0xff]   ;;  %v770_v42 = vld [vmem:[%s1083_s3 + $0xc4] ss:$8 sps:$4 sm:$0xff]   ;;  %v772_v43 = vld [vmem:[%s1083_s3 + $0xc0] ss:$8 sps:$4 sm:$0xff]  }
  0x26   :  { %403 = vmatpush1.bf16.msra.mxu1 %v760_v35  ;;  %v773_v44 = vld [vmem:[%s1083_s3 + $0xd4] ss:$8 sps:$4 sm:$0xff]   ;;  %v775_v45 = vld [vmem:[%s1083_s3 + $0xd0] ss:$8 sps:$4 sm:$0xff]   ;;  %v776_v46 = vld [vmem:[%s1083_s3 + $0xe4] ss:$8 sps:$4 sm:$0xff]  }
  0x27   :  { %404 = vmatprep.subr.bf16.mxu1 %v761_v36  ;;  %v778_v47 = vld [vmem:[%s1083_s3 + $0xe0] ss:$8 sps:$4 sm:$0xff]   ;;  %v779_v48 = vld [vmem:[%s1083_s3 + $0xf4] ss:$8 sps:$4 sm:$0xff]   ;;  %v781_v49 = vld [vmem:[%s1083_s3 + $0xf0] ss:$8 sps:$4 sm:$0xff]  }
  0x28   :  { %v782_v50 = vld [vmem:[%s1085_s5 + $0x40] sm:$0xff]   ;;  %v784_v52 = vld [vmem:[%s1085_s5 + $0x48] sm:$0xff]   ;;  %v786_v54 = vld [vmem:[%s1085_s5 + $0x50] sm:$0xff]   ;;  %v48_v63 = vshrl.u32 %v47_v62, 7 }
  0x29   :  { %v783_v51 = vld [vmem:[%s1085_s5] sm:$0xff]   ;;  %686 = vmatprep.subr.bf16.mxu0 %v782_v50  ;;  %v785_v53 = vld [vmem:[%s1085_s5 + $0x8] sm:$0xff]   ;;  %v787_v55 = vld [vmem:[%s1085_s5 + $0x10] sm:$0xff]  }
  0x2a   :  { %405 = vmatpush1.bf16.msra.mxu1 %v763_v37  ;;  %687 = vmatpush3.bf16.msra.mxu0 %v783_v51  ;;  %v788_v56 = vld [vmem:[%s1085_s5 + $0x58] sm:$0xff]   ;;  %v790_v58 = vld [vmem:[%s1085_s5 + $0x60] sm:$0xff]   ;;  %v792_v60 = vld [vmem:[%s1085_s5 + $0x68] sm:$0xff]   ;;  %v49_v0 = vsub.s32 0, %v48_v63  ;;  %v53_v2 = vsub.s32 1, %v48_v63 }
  0x2b   :  { %406 = vmatprep.subr.bf16.mxu1 %v764_v38  ;;  %688 = vmatprep.subr.bf16.mxu0 %v784_v52  ;;  %v789_v57 = vld [vmem:[%s1085_s5 + $0x18] sm:$0xff]   ;;  %v791_v59 = vld [vmem:[%s1085_s5 + $0x20] sm:$0xff]   ;;  %v793_v61 = vld [vmem:[%s1085_s5 + $0x28] sm:$0xff]  }
  0x2c   :  { %v45_v1 = vld [vmem:[%s1082_s2] sm:$0x3]  ;;  %v794_v15 = vld [vmem:[%s1085_s5 + $0x70] sm:$0xff]   ;;  %v796_v17 = vld [vmem:[%s1085_s5 + $0x78] sm:$0xff]  }
  0x2d   :  { %v50_v3 = vrot.slane %v45_v1, %v49_v0  ;;  %v54_v4 = vrot.slane %v45_v1, %v53_v2  ;;  %v795_v16 = vld [vmem:[%s1085_s5 + $0x30] sm:$0xff]   ;;  %v797_v18 = vld [vmem:[%s1085_s5 + $0x38] sm:$0xff]   ;;  %v214_v19 = vld [vmem:[%s1084_s4] sm:$0x3]  ;;  %s823_s4 = smov [#allocation2]  }
  0x2e   :  { %407 = vmatpush1.bf16.msra.mxu1 %v766_v39  ;;  %689 = vmatpush3.bf16.msra.mxu0 %v785_v53  ;;  %v219_v20 = vrot.slane %v214_v19, %v49_v0  ;;  %v223_v21 = vrot.slane %v214_v19, %v53_v2  ;;  %v669_v34 = vld [vmem:[%s1086_s6] ss:$0 sm:$0xff]  ;;  %s613_s12 = sshll.u32 %s823_s4, 4  ;;  %s614_s12 = int_to_ptr.vmem [resolvable:$true] %s613_s12 }
  0x2f   :  { %408 = vmatprep.subr.bf16.mxu1 %v767_v40  ;;  %690 = vmatprep.subr.bf16.mxu0 %v786_v54  ;;  %s798_s1 = scalar_lea.vmem %s614_s12, 128  ;;  %p803_p1 = scmp.lt.s32.totalorder %s614_s12, %s614_s12 }
  0x30   :  { %p799_p0 = scmp.ne.s32.totalorder %s614_s12, %s798_s1  ;;  %p804_p2 = scmp.lt.s32.totalorder %s798_s1, %s798_s1 }
  0x32   :  { %409 = vmatpush1.bf16.msra.mxu1 %v769_v41  ;;  %691 = vmatpush3.bf16.msra.mxu0 %v787_v55  ;;  %p805_p3 = por %p804_p2, %p803_p1 }
  0x33   :  { %410 = vmatprep.subr.bf16.mxu1 %v770_v42  ;;  %692 = vmatprep.subr.bf16.mxu0 %v788_v56 }
  0x34   :  { %p806_p4 = pnand %p805_p3, %p799_p0 }
  0x36   :  { %411 = vmatpush1.bf16.msra.mxu1 %v772_v43  ;;  %693 = vmatpush3.bf16.msra.mxu0 %v789_v57 }
  0x37   :  { %412 = vmatprep.subr.bf16.mxu1 %v773_v44  ;;  %694 = vmatprep.subr.bf16.mxu0 %v790_v58 }
  0x3a   :  { %413 = vmatpush1.bf16.msra.mxu1 %v775_v45  ;;  %695 = vmatpush3.bf16.msra.mxu0 %v791_v59 }
  0x3b   :  { %414 = vmatprep.subr.bf16.mxu1 %v776_v46  ;;  %696 = vmatprep.subr.bf16.mxu0 %v792_v60 }
  0x3e   :  { %415 = vmatpush1.bf16.msra.mxu1 %v778_v47  ;;  %697 = vmatpush3.bf16.msra.mxu0 %v793_v61 }
  0x3f   :  { %416 = vmatprep.subr.bf16.mxu1 %v779_v48  ;;  %698 = vmatprep.subr.bf16.mxu0 %v794_v15 }
  0x42   :  { %417 = vmatpush1.bf16.msra.mxu1 %v781_v49  ;;  %699 = vmatpush3.bf16.msra.mxu0 %v795_v16 }
  0x43   :  { %700 = vmatprep.subr.bf16.mxu0 %v796_v17 }
  0x46   :  { %701 = vmatpush3.bf16.msra.mxu0 %v797_v18 }
  0xf5   :  { %v171_v5 = vpop.f32.mrb[0].mxu0 }
  0xf6   :  { %v172_v6 = vadd.f32 %v171_v5, %v50_v3  ;;  %v173_v7 = vpop.f32.mrb[1].mxu0 }
  0xf7   :  { %v174_v8 = vadd.f32 %v173_v7, %v54_v4  ;;  %v175_v9 = vpop.f32.mrb[2].mxu0 }
  0xf8   :  { %v178_v10 = vmax.f32 %v172_v6, 0.0  ;;  %v176_v11 = vpop.f32.mrb[3].mxu0 }
  0xf9   :  { %v179_v12 = vmax.f32 %v174_v8, 0.0 }
  0xfa   :  { %v180_v14 = vpack.c.bf16 %v178_v10, %v178_v10 }
  0xfb   :  { %v181_v13 = vpack.c.bf16 %v179_v12, %v179_v12 }
  0xfd   :  { %418 = vmatprep.mubr.bf16.mxu1 %v181_v13 }
  0xfe   :  { %419 = vmatmul.mubr.bf16.vlgmr.msra.gmra.mrb[0].mxu1 %v180_v14 }
 0x1d1   :  { %v420_v22 = vpop.f32.mrb[0].mxu1 }
 0x1d2   :  { %v421_v23 = vadd.f32 %v420_v22, %v219_v20  ;;  %v422_v24 = vpop.f32.mrb[1].mxu1 }
 0x1d3   :  { %v423_v25 = vadd.f32 %v422_v24, %v223_v21  ;;  %v424_v26 = vpop.f32.mrb[2].mxu1 }
 0x1d4   :  { %v427_v27 = vmax.f32 %v421_v23, 0.0  ;;  %v425_v28 = vpop.f32.mrb[3].mxu1 }
 0x1d5   :  { %v428_v29 = vmax.f32 %v423_v25, 0.0 }
 0x1d6   :  { %v429_v31 = vpack.c.bf16 %v427_v27, %v427_v27 }
 0x1d7   :  { %v430_v30 = vpack.c.bf16 %v428_v29, %v428_v29 }
 0x1d9   :  { %598 = vmatprep.mubr.bf16.mxu0 %v430_v30 }
 0x1da   :  { %599 = vmatmul.mubr.bf16.vlgmr.msra.gmra.mrb[4].mxu0 %v429_v31 }
 0x2ad   :  { %v702_v32 = vpop.f32.mrb[4].mxu0 }
 0x2ae   :  { %v703_v33 = vpop.f32.mrb[5].mxu0 }
 0x2af   :  { %v704_v35 = vadd.f32 %v703_v33, %v702_v32  ;;  %v705_v36 = vpop.f32.mrb[6].mxu0 }
 0x2b0   :  { %v706_v37 = vpop.f32.mrb[7].mxu0 }
 0x2b1   :  { %v601_v38 = vadd.f32 %v704_v35, %v669_v34 }
 0x2b3   :  { %606 = vst [vmem:[#allocation2] sm:$0xff] %v601_v38 }
 0x2b4   :  { %809 = shalt.err (!%p806_p4)
}
 0x2b5   :  { %s810_s15 = scalar_lea.hbm %s1087_s7, 128 }
 0x2b6   :  { %p811_p5 = scmp.ne.s32.totalorder %s1087_s7, %s810_s15  ;;  %p814_p6 = scmp.lt.u32.totalorder %s810_s15, %s1087_s7 }
 0x2b8   :  { %p816_p7 = pnand %p814_p6, %p811_p5 }
 0x2ba   :  { %819 = shalt.err (!%p816_p7)
}
 0x2bb   :  { %616 = dma.vmem_to_hbm [thread:$0]  %s614_s12, 128, %s1087_s7, [#allocation3]  }
 0x2bc   :  { %820 = dma.done.wait [#allocation3], 128  }
 0x2bd   :  { %821 = vsyncadd [#allocation3], 4294967168 }
 0x2be   :  { %620 = vsyncpa [#allocation3], 1 }

// kernel: qnet_forward.1
= control target key start
LH: loop header
LB: loop body
LE: loop exit
PB: predicated region body
PF: predicated region fallthrough
CT: control target
= control target key end

     0   :  { %v822_v2 = vmov 0   ;;  %s1080_s0 = inlined_call_operand.vmem [shape: bf16[8,128], index: 0, kind: input, shape index: {}]   ;;  %s1081_s1 = inlined_call_operand.vmem [shape: bf16[128,256], index: 1, kind: input, shape index: {}]   ;;  %s1082_s2 = inlined_call_operand.vmem [shape: f32[1,256], index: 2, kind: input, shape index: {}]   ;;  %s1083_s3 = inlined_call_operand.vmem [shape: bf16[256,256], index: 3, kind: input, shape index: {}]   ;;  %s1084_s4 = inlined_call_operand.vmem [shape: f32[1,256], index: 4, kind: input, shape index: {}]   ;;  %s1085_s5 = inlined_call_operand.vmem [shape: bf16[256,128], index: 5, kind: input, shape index: {}]   ;;  %s1086_s6 = inlined_call_operand.vmem [shape: f32[1,128], index: 6, kind: input, shape index: {}]   ;;  %s1087_s7 = inlined_call_operand.hbm [shape: f32[8,128], index: 7, kind: output, shape index: {}]  }
   0x1   :  { %v710_v0 = vld [vmem:[%s1081_s1 + $0x4] ss:$8 sps:$4 sm:$0xff]   ;;  %v712_v1 = vld [vmem:[%s1081_s1] ss:$8 sps:$4 sm:$0xff]   ;;  %169 = vmatprep.mubr.bf16.mxu0 %v822_v2  ;;  %v713_v3 = vld [vmem:[%s1081_s1 + $0x14] ss:$8 sps:$4 sm:$0xff]  }
   0x2   :  { %137 = vmatprep.subr.bf16.mxu0 %v710_v0  ;;  %v715_v4 = vld [vmem:[%s1081_s1 + $0x10] ss:$8 sps:$4 sm:$0xff]   ;;  %v716_v5 = vld [vmem:[%s1081_s1 + $0x24] ss:$8 sps:$4 sm:$0xff]   ;;  %v718_v6 = vld [vmem:[%s1081_s1 + $0x20] ss:$8 sps:$4 sm:$0xff]  }
   0x3   :  { %138 = vmatpush1.bf16.msra.mxu0 %v712_v1  ;;  %v719_v7 = vld [vmem:[%s1081_s1 + $0x34] ss:$8 sps:$4 sm:$0xff]   ;;  %v721_v8 = vld [vmem:[%s1081_s1 + $0x30] ss:$8 sps:$4 sm:$0xff]   ;;  %v722_v9 = vld [vmem:[%s1081_s1 + $0x44] ss:$8 sps:$4 sm:$0xff]  }
   0x4   :  { %139 = vmatprep.subr.bf16.mxu0 %v713_v3  ;;  %v734_v10 = vld [vmem:[%s1083_s3 + $0x4] ss:$8 sps:$4 sm:$0xff]   ;;  %v736_v11 = vld [vmem:[%s1083_s3] ss:$8 sps:$4 sm:$0xff]   ;;  %v737_v12 = vld [vmem:[%s1083_s3 + $0x14] ss:$8 sps:$4 sm:$0xff]  }
   0x5   :  { %386 = vmatprep.subr.bf16.mxu1 %v734_v10  ;;  %v724_v13 = vld [vmem:[%s1081_s1 + $0x40] ss:$8 sps:$4 sm:$0xff]   ;;  %v739_v14 = vld [vmem:[%s1083_s3 + $0x10] ss:$8 sps:$4 sm:$0xff]   ;;  %v740_v15 = vld [vmem:[%s1083_s3 + $0x24] ss:$8 sps:$4 sm:$0xff]  }
   0x6   :  { %387 = vmatpush1.bf16.msra.mxu1 %v736_v11  ;;  %v725_v16 = vld [vmem:[%s1081_s1 + $0x54] ss:$8 sps:$4 sm:$0xff]   ;;  %v727_v17 = vld [vmem:[%s1081_s1 + $0x50] ss:$8 sps:$4 sm:$0xff]   ;;  %v742_v18 = vld [vmem:[%s1083_s3 + $0x20] ss:$8 sps:$4 sm:$0xff]  }
   0x7   :  { %140 = vmatpush1.bf16.msra.mxu0 %v715_v4  ;;  %388 = vmatprep.subr.bf16.mxu1 %v737_v12  ;;  %v743_v19 = vld [vmem:[%s1083_s3 + $0x34] ss:$8 sps:$4 sm:$0xff]   ;;  %v728_v20 = vld [vmem:[%s1081_s1 + $0x64] ss:$8 sps:$4 sm:$0xff]   ;;  %v730_v21 = vld [vmem:[%s1081_s1 + $0x60] ss:$8 sps:$4 sm:$0xff]  }
   0x8   :  { %141 = vmatprep.subr.bf16.mxu0 %v716_v5  ;;  %v745_v22 = vld [vmem:[%s1083_s3 + $0x30] ss:$8 sps:$4 sm:$0xff]   ;;  %v746_v23 = vld [vmem:[%s1083_s3 + $0x44] ss:$8 sps:$4 sm:$0xff]   ;;  %v731_v24 = vld [vmem:[%s1081_s1 + $0x74] ss:$8 sps:$4 sm:$0xff]  }
   0x9   :  { %v733_v25 = vld [vmem:[%s1081_s1 + $0x70] ss:$8 sps:$4 sm:$0xff]   ;;  %v748_v26 = vld [vmem:[%s1083_s3 + $0x40] ss:$8 sps:$4 sm:$0xff]   ;;  %v749_v27 = vld [vmem:[%s1083_s3 + $0x54] ss:$8 sps:$4 sm:$0xff]  }
   0xa   :  { %389 = vmatpush1.bf16.msra.mxu1 %v739_v14  ;;  %v28_v28 = vld [vmem:[%s1080_s0] sm:$0xf]  ;;  %v751_v29 = vld [vmem:[%s1083_s3 + $0x50] ss:$8 sps:$4 sm:$0xff]   ;;  %v752_v30 = vld [vmem:[%s1083_s3 + $0x64] ss:$8 sps:$4 sm:$0xff]  }
   0xb   :  { %142 = vmatpush1.bf16.msra.mxu0 %v718_v6  ;;  %390 = vmatprep.subr.bf16.mxu1 %v740_v15  ;;  %v754_v31 = vld [vmem:[%s1083_s3 + $0x60] ss:$8 sps:$4 sm:$0xff]   ;;  %v755_v32 = vld [vmem:[%s1083_s3 + $0x74] ss:$8 sps:$4 sm:$0xff]   ;;  %v757_v33 = vld [vmem:[%s1083_s3 + $0x70] ss:$8 sps:$4 sm:$0xff]  }
   0xc   :  { %143 = vmatprep.subr.bf16.mxu0 %v719_v7  ;;  %v758_v34 = vld [vmem:[%s1083_s3 + $0x84] ss:$8 sps:$4 sm:$0xff]   ;;  %v760_v35 = vld [vmem:[%s1083_s3 + $0x80] ss:$8 sps:$4 sm:$0xff]  }
   0xe   :  { %391 = vmatpush1.bf16.msra.mxu1 %v742_v18 }
   0xf   :  { %144 = vmatpush1.bf16.msra.mxu0 %v721_v8  ;;  %392 = vmatprep.subr.bf16.mxu1 %v743_v19 }
  0x10   :  { %145 = vmatprep.subr.bf16.mxu0 %v722_v9 }
  0x12   :  { %393 = vmatpush1.bf16.msra.mxu1 %v745_v22 }
  0x13   :  { %146 = vmatpush1.bf16.msra.mxu0 %v724_v13  ;;  %394 = vmatprep.subr.bf16.mxu1 %v746_v23 }
  0x14   :  { %147 = vmatprep.subr.bf16.mxu0 %v725_v16 }
  0x16   :  { %395 = vmatpush1.bf16.msra.mxu1 %v748_v26 }
  0x17   :  { %148 = vmatpush1.bf16.msra.mxu0 %v727_v17  ;;  %396 = vmatprep.subr.bf16.mxu1 %v749_v27 }
  0x18   :  { %149 = vmatprep.subr.bf16.mxu0 %v728_v20 }
  0x1a   :  { %397 = vmatpush1.bf16.msra.mxu1 %v751_v29 }
  0x1b   :  { %150 = vmatpush1.bf16.msra.mxu0 %v730_v21  ;;  %398 = vmatprep.subr.bf16.mxu1 %v752_v30 }
  0x1c   :  { %151 = vmatprep.subr.bf16.mxu0 %v731_v24 }
  0x1e   :  { %399 = vmatpush1.bf16.msra.mxu1 %v754_v31 }
  0x1f   :  { %152 = vmatpush1.bf16.msra.mxu0 %v733_v25  ;;  %400 = vmatprep.subr.bf16.mxu1 %v755_v32 }
  0x22   :  { %170 = vmatmul.mubr.bf16.vlgmr.msra.gmra.mrb[0].mxu0 %v28_v28  ;;  %401 = vmatpush1.bf16.msra.mxu1 %v757_v33 }
  0x23   :  { %12 = vsyncpa [#allocation3], 0  ;;  %402 = vmatprep.subr.bf16.mxu1 %v758_v34  ;;  %v761_v36 = vld [vmem:[%s1083_s3 + $0x94] ss:$8 sps:$4 sm:$0xff]   ;;  %v763_v37 = vld [vmem:[%s1083_s3 + $0x90] ss:$8 sps:$4 sm:$0xff]   ;;  %v47_v62 = vlaneseq }
  0x24   :  { %v764_v38 = vld [vmem:[%s1083_s3 + $0xa4] ss:$8 sps:$4 sm:$0xff]   ;;  %v766_v39 = vld [vmem:[%s1083_s3 + $0xa0] ss:$8 sps:$4 sm:$0xff]   ;;  %v767_v40 = vld [vmem:[%s1083_s3 + $0xb4] ss:$8 sps:$4 sm:$0xff]  }
  0x25   :  { %v769_v41 = vld [vmem:[%s1083_s3 + $0xb0] ss:$8 sps:$4 sm:$0xff]   ;;  %v770_v42 = vld [vmem:[%s1083_s3 + $0xc4] ss:$8 sps:$4 sm:$0xff]   ;;  %v772_v43 = vld [vmem:[%s1083_s3 + $0xc0] ss:$8 sps:$4 sm:$0xff]  }
  0x26   :  { %403 = vmatpush1.bf16.msra.mxu1 %v760_v35  ;;  %v773_v44 = vld [vmem:[%s1083_s3 + $0xd4] ss:$8 sps:$4 sm:$0xff]   ;;  %v775_v45 = vld [vmem:[%s1083_s3 + $0xd0] ss:$8 sps:$4 sm:$0xff]   ;;  %v776_v46 = vld [vmem:[%s1083_s3 + $0xe4] ss:$8 sps:$4 sm:$0xff]  }
  0x27   :  { %404 = vmatprep.subr.bf16.mxu1 %v761_v36  ;;  %v778_v47 = vld [vmem:[%s1083_s3 + $0xe0] ss:$8 sps:$4 sm:$0xff]   ;;  %v779_v48 = vld [vmem:[%s1083_s3 + $0xf4] ss:$8 sps:$4 sm:$0xff]   ;;  %v781_v49 = vld [vmem:[%s1083_s3 + $0xf0] ss:$8 sps:$4 sm:$0xff]  }
  0x28   :  { %v782_v50 = vld [vmem:[%s1085_s5 + $0x40] sm:$0xff]   ;;  %v784_v52 = vld [vmem:[%s1085_s5 + $0x48] sm:$0xff]   ;;  %v786_v54 = vld [vmem:[%s1085_s5 + $0x50] sm:$0xff]   ;;  %v48_v63 = vshrl.u32 %v47_v62, 7 }
  0x29   :  { %v783_v51 = vld [vmem:[%s1085_s5] sm:$0xff]   ;;  %686 = vmatprep.subr.bf16.mxu0 %v782_v50  ;;  %v785_v53 = vld [vmem:[%s1085_s5 + $0x8] sm:$0xff]   ;;  %v787_v55 = vld [vmem:[%s1085_s5 + $0x10] sm:$0xff]  }
  0x2a   :  { %405 = vmatpush1.bf16.msra.mxu1 %v763_v37  ;;  %687 = vmatpush3.bf16.msra.mxu0 %v783_v51  ;;  %v788_v56 = vld [vmem:[%s1085_s5 + $0x58] sm:$0xff]   ;;  %v790_v58 = vld [vmem:[%s1085_s5 + $0x60] sm:$0xff]   ;;  %v792_v60 = vld [vmem:[%s1085_s5 + $0x68] sm:$0xff]   ;;  %v49_v0 = vsub.s32 0, %v48_v63  ;;  %v53_v2 = vsub.s32 1, %v48_v63 }
  0x2b   :  { %406 = vmatprep.subr.bf16.mxu1 %v764_v38  ;;  %688 = vmatprep.subr.bf16.mxu0 %v784_v52  ;;  %v789_v57 = vld [vmem:[%s1085_s5 + $0x18] sm:$0xff]   ;;  %v791_v59 = vld [vmem:[%s1085_s5 + $0x20] sm:$0xff]   ;;  %v793_v61 = vld [vmem:[%s1085_s5 + $0x28] sm:$0xff]  }
  0x2c   :  { %v45_v1 = vld [vmem:[%s1082_s2] sm:$0x3]  ;;  %v794_v15 = vld [vmem:[%s1085_s5 + $0x70] sm:$0xff]   ;;  %v796_v17 = vld [vmem:[%s1085_s5 + $0x78] sm:$0xff]  }
  0x2d   :  { %v50_v3 = vrot.slane %v45_v1, %v49_v0  ;;  %v54_v4 = vrot.slane %v45_v1, %v53_v2  ;;  %v795_v16 = vld [vmem:[%s1085_s5 + $0x30] sm:$0xff]   ;;  %v797_v18 = vld [vmem:[%s1085_s5 + $0x38] sm:$0xff]   ;;  %v214_v19 = vld [vmem:[%s1084_s4] sm:$0x3]  ;;  %s823_s4 = smov [#allocation2]  }
  0x2e   :  { %407 = vmatpush1.bf16.msra.mxu1 %v766_v39  ;;  %689 = vmatpush3.bf16.msra.mxu0 %v785_v53  ;;  %v219_v20 = vrot.slane %v214_v19, %v49_v0  ;;  %v223_v21 = vrot.slane %v214_v19, %v53_v2  ;;  %v669_v34 = vld [vmem:[%s1086_s6] ss:$0 sm:$0xff]  ;;  %s613_s12 = sshll.u32 %s823_s4, 4  ;;  %s614_s12 = int_to_ptr.vmem [resolvable:$true] %s613_s12 }
  0x2f   :  { %408 = vmatprep.subr.bf16.mxu1 %v767_v40  ;;  %690 = vmatprep.subr.bf16.mxu0 %v786_v54  ;;  %s798_s1 = scalar_lea.vmem %s614_s12, 128  ;;  %p803_p1 = scmp.lt.s32.totalorder %s614_s12, %s614_s12 }
  0x30   :  { %p799_p0 = scmp.ne.s32.totalorder %s614_s12, %s798_s1  ;;  %p804_p2 = scmp.lt.s32.totalorder %s798_s1, %s798_s1 }
  0x32   :  { %409 = vmatpush1.bf16.msra.mxu1 %v769_v41  ;;  %691 = vmatpush3.bf16.msra.mxu0 %v787_v55  ;;  %p805_p3 = por %p804_p2, %p803_p1 }
  0x33   :  { %410 = vmatprep.subr.bf16.mxu1 %v770_v42  ;;  %692 = vmatprep.subr.bf16.mxu0 %v788_v56 }
  0x34   :  { %p806_p4 = pnand %p805_p3, %p799_p0 }
  0x36   :  { %411 = vmatpush1.bf16.msra.mxu1 %v772_v43  ;;  %693 = vmatpush3.bf16.msra.mxu0 %v789_v57 }
  0x37   :  { %412 = vmatprep.subr.bf16.mxu1 %v773_v44  ;;  %694 = vmatprep.subr.bf16.mxu0 %v790_v58 }
  0x3a   :  { %413 = vmatpush1.bf16.msra.mxu1 %v775_v45  ;;  %695 = vmatpush3.bf16.msra.mxu0 %v791_v59 }
  0x3b   :  { %414 = vmatprep.subr.bf16.mxu1 %v776_v46  ;;  %696 = vmatprep.subr.bf16.mxu0 %v792_v60 }
  0x3e   :  { %415 = vmatpush1.bf16.msra.mxu1 %v778_v47  ;;  %697 = vmatpush3.bf16.msra.mxu0 %v793_v61 }
  0x3f   :  { %416 = vmatprep.subr.bf16.mxu1 %v779_v48  ;;  %698 = vmatprep.subr.bf16.mxu0 %v794_v15 }
  0x42   :  { %417 = vmatpush1.bf16.msra.mxu1 %v781_v49  ;;  %699 = vmatpush3.bf16.msra.mxu0 %v795_v16 }
  0x43   :  { %700 = vmatprep.subr.bf16.mxu0 %v796_v17 }
  0x46   :  { %701 = vmatpush3.bf16.msra.mxu0 %v797_v18 }
  0xf5   :  { %v171_v5 = vpop.f32.mrb[0].mxu0 }
  0xf6   :  { %v172_v6 = vadd.f32 %v171_v5, %v50_v3  ;;  %v173_v7 = vpop.f32.mrb[1].mxu0 }
  0xf7   :  { %v174_v8 = vadd.f32 %v173_v7, %v54_v4  ;;  %v175_v9 = vpop.f32.mrb[2].mxu0 }
  0xf8   :  { %v178_v10 = vmax.f32 %v172_v6, 0.0  ;;  %v176_v11 = vpop.f32.mrb[3].mxu0 }
  0xf9   :  { %v179_v12 = vmax.f32 %v174_v8, 0.0 }
  0xfa   :  { %v180_v14 = vpack.c.bf16 %v178_v10, %v178_v10 }
  0xfb   :  { %v181_v13 = vpack.c.bf16 %v179_v12, %v179_v12 }
  0xfd   :  { %418 = vmatprep.mubr.bf16.mxu1 %v181_v13 }
  0xfe   :  { %419 = vmatmul.mubr.bf16.vlgmr.msra.gmra.mrb[0].mxu1 %v180_v14 }
 0x1d1   :  { %v420_v22 = vpop.f32.mrb[0].mxu1 }
 0x1d2   :  { %v421_v23 = vadd.f32 %v420_v22, %v219_v20  ;;  %v422_v24 = vpop.f32.mrb[1].mxu1 }
 0x1d3   :  { %v423_v25 = vadd.f32 %v422_v24, %v223_v21  ;;  %v424_v26 = vpop.f32.mrb[2].mxu1 }
 0x1d4   :  { %v427_v27 = vmax.f32 %v421_v23, 0.0  ;;  %v425_v28 = vpop.f32.mrb[3].mxu1 }
 0x1d5   :  { %v428_v29 = vmax.f32 %v423_v25, 0.0 }
 0x1d6   :  { %v429_v31 = vpack.c.bf16 %v427_v27, %v427_v27 }
 0x1d7   :  { %v430_v30 = vpack.c.bf16 %v428_v29, %v428_v29 }
 0x1d9   :  { %598 = vmatprep.mubr.bf16.mxu0 %v430_v30 }
 0x1da   :  { %599 = vmatmul.mubr.bf16.vlgmr.msra.gmra.mrb[4].mxu0 %v429_v31 }
 0x2ad   :  { %v702_v32 = vpop.f32.mrb[4].mxu0 }
 0x2ae   :  { %v703_v33 = vpop.f32.mrb[5].mxu0 }
 0x2af   :  { %v704_v35 = vadd.f32 %v703_v33, %v702_v32  ;;  %v705_v36 = vpop.f32.mrb[6].mxu0 }
 0x2b0   :  { %v706_v37 = vpop.f32.mrb[7].mxu0 }
 0x2b1   :  { %v601_v38 = vadd.f32 %v704_v35, %v669_v34 }
 0x2b3   :  { %606 = vst [vmem:[#allocation2] sm:$0xff] %v601_v38 }
 0x2b4   :  { %809 = shalt.err (!%p806_p4)
}
 0x2b5   :  { %s810_s15 = scalar_lea.hbm %s1087_s7, 128 }
 0x2b6   :  { %p811_p5 = scmp.ne.s32.totalorder %s1087_s7, %s810_s15  ;;  %p814_p6 = scmp.lt.u32.totalorder %s810_s15, %s1087_s7 }
 0x2b8   :  { %p816_p7 = pnand %p814_p6, %p811_p5 }
 0x2ba   :  { %819 = shalt.err (!%p816_p7)
}
 0x2bb   :  { %616 = dma.vmem_to_hbm [thread:$0]  %s614_s12, 128, %s1087_s7, [#allocation3]  }
 0x2bc   :  { %820 = dma.done.wait [#allocation3], 128  }
 0x2bd   :  { %821 = vsyncadd [#allocation3], 4294967168 }
 0x2be   :  { %620 = vsyncpa [#allocation3], 1 }

</bundles_post_ra>
